<compile_context>
chip_gen: v5e
topology: v5e:2x2
jax: 0.10.0
libtpu: 0.0.40
codegen_flags: <defaults>
</compile_context>

<pallas_src>
import functools

import jax
import jax.numpy as jnp
from jax import lax
from jax.experimental import pallas as pl
from jax.experimental.pallas import tpu as pltpu

LANE = 128
DEFAULT_BLOCK = 128   # dst/src block size (>=128 keeps the MXU matmuls fed)


def _round_up(v, m):
    return ((v + m - 1) // m) * m


def _pad2(a, rows, cols):
    return jnp.pad(a, ((0, rows - a.shape[0]), (0, cols - a.shape[1])))


# ----------------------------------------------------------------------------
# Kernel 1: fused left/right linear transform.
# ----------------------------------------------------------------------------
def _linear_kernel(x_ref, w_ref, b_ref, xl_ref, xr_ref, *, c_pad):
    xlr = jnp.dot(x_ref[...].astype(jnp.bfloat16), w_ref[...],
                  preferred_element_type=jnp.float32) + b_ref[...]
    xl_ref[...] = xlr[:, :c_pad]
    xr_ref[...] = xlr[:, c_pad:]


def _linear_call(x_pad, w_cat, b_cat, c_pad, tr):
    n_pad, f_pad = x_pad.shape
    kernel = functools.partial(_linear_kernel, c_pad=c_pad)
    return pl.pallas_call(
        kernel,
        out_shape=(jax.ShapeDtypeStruct((n_pad, c_pad), jnp.float32),
                   jax.ShapeDtypeStruct((n_pad, c_pad), jnp.float32)),
        grid=(n_pad // tr,),
        in_specs=[pl.BlockSpec((tr, f_pad), lambda i: (i, 0)),
                  pl.BlockSpec((f_pad, 2 * c_pad), lambda i: (0, 0)),
                  pl.BlockSpec((1, 2 * c_pad), lambda i: (0, 0))],
        out_specs=(pl.BlockSpec((tr, c_pad), lambda i: (i, 0)),
                   pl.BlockSpec((tr, c_pad), lambda i: (i, 0))),
        compiler_params=pltpu.CompilerParams(
            dimension_semantics=("parallel",)),
    )(x_pad, w_cat, b_cat)


# ----------------------------------------------------------------------------
# Kernel 2: tiled GATv2 attention with online softmax (normalization deferred).
# ----------------------------------------------------------------------------
def _gat_attn_kernel(xr_ref, xl_ref, att_ref, bias_ref, adj_ref, out_ref,
                     m_ref, l_ref, acc_ref, *, apply_relu):
    dk = pl.program_id(1)

    @pl.when(dk == 0)
    def _():
        m_ref[...] = jnp.full(m_ref.shape, -1e30, m_ref.dtype)
        l_ref[...] = jnp.zeros(l_ref.shape, l_ref.dtype)
        acc_ref[...] = jnp.zeros(acc_ref.shape, acc_ref.dtype)

    xr = xr_ref[...]                       # [TQ, C]  dst-side transform
    xl = xl_ref[...]                       # [TK, C]  src-side transform
    att = att_ref[...]                     # [1, C]
    neigh = adj_ref[...] > 0               # [TQ, TK] bool (int8 adjacency)

    # att . leaky_relu(z), z = xl[j] + xr[i], decomposed as
    #   0.2*(att.xl[j] + att.xr[i]) + 0.8*att.relu(z)
    # Rank-1 linear parts run on the MXU; only relu(z) touches the big
    # [TQ,TK,C] tensor (add + max + mul on VPU, lane-reduce on XLU).
    sr = 0.2 * lax.dot_general(xr, att, (((1,), (1,)), ((), ())),
                               preferred_element_type=jnp.float32)   # [TQ, 1]
    sl = 0.2 * lax.dot_general(att, xl, (((1,), (1,)), ((), ())),
                               preferred_element_type=jnp.float32)   # [1, TK]
    z = xl[None, :, :] + xr[:, None, :]                              # [TQ,TK,C]
    s_relu = jnp.sum(jnp.maximum(z, 0.0) * (0.8 * att)[None, :, :], axis=-1)
    scores = s_relu + sr + sl                                        # [TQ, TK]
    masked = jnp.where(neigh, scores, -1e30)

    # Online softmax over src blocks; re-mask post-exp so fully-masked rows in
    # this block contribute exactly zero.
    m_prev = m_ref[...]
    m_new = jnp.maximum(m_prev, jnp.max(masked, axis=1, keepdims=True))
    corr = jnp.exp(m_prev - m_new)
    p = jnp.where(neigh, jnp.exp(masked - m_new), 0.0)
    l_ref[...] = corr * l_ref[...] + jnp.sum(p, axis=1, keepdims=True)
    acc_ref[...] = corr * acc_ref[...] + jnp.dot(
        p.astype(jnp.bfloat16), xl.astype(jnp.bfloat16),
        preferred_element_type=jnp.float32)
    m_ref[...] = m_new

    @pl.when(dk == pl.num_programs(1) - 1)
    def _():
        denom = jnp.maximum(l_ref[...], 1e-30)      # guard isolated/padded rows
        out = acc_ref[...] / denom + bias_ref[...]  # f32 normalize after matmul
        if apply_relu:
            out = jnp.maximum(out, 0.0)
        out_ref[...] = out.astype(out_ref.dtype)


def _attention_call(xl, xr, att, bias, adj_i8, tq, tk, apply_relu):
    n_pad, c_pad = xl.shape
    nq, nk = n_pad // tq, n_pad // tk
    kernel = functools.partial(_gat_attn_kernel, apply_relu=apply_relu)

    vmem_limit = int(min(max(3 * tq * tk * c_pad * 4          # score-block temps
                             + 6 * tq * c_pad * 4             # xr/out/acc buffers
                             + 2 * tk * c_pad * 4              # xl double buffer
                             + 2 * tq * tk                     # int8 adj
                             + (4 << 20), 16 << 20), 56 << 20))
    cost = pl.CostEstimate(
        flops=8 * n_pad * n_pad * c_pad,
        transcendentals=n_pad * n_pad,
        bytes_accessed=n_pad * n_pad + nq * n_pad * c_pad * 4
                       + 3 * n_pad * c_pad * 4)

    return pl.pallas_call(
        kernel,
        out_shape=jax.ShapeDtypeStruct((n_pad, c_pad), jnp.float32),
        grid=(nq, nk),
        in_specs=[pl.BlockSpec((tq, c_pad), lambda dq, dk: (dq, 0)),   # xr
                  pl.BlockSpec((tk, c_pad), lambda dq, dk: (dk, 0)),   # xl
                  pl.BlockSpec((1, c_pad), lambda dq, dk: (0, 0)),     # att
                  pl.BlockSpec((1, c_pad), lambda dq, dk: (0, 0)),     # bias
                  pl.BlockSpec((tq, tk), lambda dq, dk: (dq, dk))],    # adj int8
        out_specs=pl.BlockSpec((tq, c_pad), lambda dq, dk: (dq, 0)),
        scratch_shapes=[pltpu.VMEM((tq, 1), jnp.float32),     # running max
                        pltpu.VMEM((tq, 1), jnp.float32),     # running sum
                        pltpu.VMEM((tq, c_pad), jnp.float32)],  # accumulator
        compiler_params=pltpu.CompilerParams(
            dimension_semantics=("parallel", "arbitrary"),
            vmem_limit_bytes=vmem_limit),
        cost_estimate=cost,
    )(xr, xl, att, bias, adj_i8)


# ----------------------------------------------------------------------------
# Parameter packing + full forward.
# ----------------------------------------------------------------------------
def _pack_params(p, in_pad, out_pad):
    """Zero-pad channel dims to 128 lanes and fuse Wl|Wr (bf16) and bl|br."""
    wl = _pad2(p["wl"], in_pad, out_pad)
    wr = _pad2(p["wr"], in_pad, out_pad)
    w_cat = jnp.concatenate([wl, wr], axis=1).astype(jnp.bfloat16)
    b_cat = jnp.concatenate([_pad2(p["bl"], 1, out_pad),
                             _pad2(p["br"], 1, out_pad)], axis=1)
    att = _pad2(p["att"], 1, out_pad)
    bias = _pad2(p["bias"], 1, out_pad)
    return w_cat, b_cat, att, bias


def gatnet_forward(x, adj, p1, p2, *, block=DEFAULT_BLOCK):
    n, f = x.shape
    c1 = p1["wl"].shape[1]
    c2 = p2["wl"].shape[1]
    f_pad = _round_up(f, LANE)
    c1_pad = _round_up(c1, LANE)
    c2_pad = _round_up(c2, LANE)

    tq = tk = block if n >= block else _round_up(n, 8)
    n_pad = _round_up(n, tq)

    x_pad = _pad2(x, n_pad, f_pad)
    # int8 adjacency mask: 4x less DMA/VMEM than an f32 additive bias.
    adj_i8 = _pad2((adj > 0).astype(jnp.int8), n_pad, n_pad)

    w1, b1, att1, bias1 = _pack_params(p1, f_pad, c1_pad)
    w2, b2, att2, bias2 = _pack_params(p2, c1_pad, c2_pad)

    # Layer 1 (ReLU fused into the attention finalize).
    xl1, xr1 = _linear_call(x_pad, w1, b1, c1_pad, tq)
    h = _attention_call(xl1, xr1, att1, bias1, adj_i8, tq, tk, apply_relu=True)
    # dropout(p=0.5) in eval mode -> identity.

    # Layer 2.
    xl2, xr2 = _linear_call(h, w2, b2, c2_pad, tq)
    out = _attention_call(xl2, xr2, att2, bias2, adj_i8, tq, tk,
                          apply_relu=False)
    return out[:n, :c2]


# ----------------------------------------------------------------------------
# Parameter init + demo.
# ----------------------------------------------------------------------------
def glorot(key, shape):
    fan_in, fan_out = shape[0], shape[1]
    limit = (6.0 / (fan_in + fan_out)) ** 0.5
    return jax.random.uniform(key, shape, jnp.float32, -limit, limit)


def init_gatv2_params(key, in_ch, out_ch):
    k = jax.random.split(key, 3)
    return {
        "wl": glorot(k[0], (in_ch, out_ch)),
        "bl": jnp.zeros((1, out_ch), jnp.float32),
        "wr": glorot(k[1], (in_ch, out_ch)),
        "br": jnp.zeros((1, out_ch), jnp.float32),
        "att": glorot(k[2], (1, out_ch)),
        "bias": jnp.zeros((1, out_ch), jnp.float32),
    }


if __name__ == "__main__":
    num_nodes = 16
    num_features = 8
    hidden_channels = 16
    num_classes = 4

    key = jax.random.PRNGKey(0)
    kx, k1, k2 = jax.random.split(key, 3)

    # Node features.
    x = jax.random.normal(kx, (num_nodes, num_features), jnp.float32)

    # Deterministic edge_index: bidirectional ring + a few chords. [2, E]
    src = list(range(num_nodes)) + list(range(num_nodes)) + [0, 3, 7, 11]
    dst = ([(i + 1) % num_nodes for i in range(num_nodes)]
           + [(i - 1) % num_nodes for i in range(num_nodes)]
           + [8, 12, 2, 5])
    edge_index = jnp.array([src, dst], dtype=jnp.int32)

    # Dense adjacency A[dst, src] = 1; add self-loops (PyG default).
    adj = jnp.zeros((num_nodes, num_nodes), jnp.float32)
    adj = adj.at[edge_index[1], edge_index[0]].set(1.0)
    adj = jnp.maximum(adj, jnp.eye(num_nodes, dtype=jnp.float32))

    params1 = init_gatv2_params(k1, num_features, hidden_channels)
    params2 = init_gatv2_params(k2, hidden_channels, num_classes)

    out = gatnet_forward(x, adj, params1, params2)
    jax.block_until_ready(out)
    assert out.shape == (num_nodes, num_classes)
    assert bool(jnp.all(jnp.isfinite(out)))
    print("KERNEL_OK")
</pallas_src>

<mosaic_0001>
module attributes {stable_mosaic.version = 11 : i64} {
  func.func @_linear_kernel(%arg0: i32, %arg1: memref<16x128xf32, #tpu.memory_space<vmem>>, %arg2: memref<128x256xbf16, #tpu.memory_space<vmem>>, %arg3: memref<1x256xf32, #tpu.memory_space<vmem>>, %arg4: memref<16x128xf32, #tpu.memory_space<vmem>>, %arg5: memref<16x128xf32, #tpu.memory_space<vmem>>) attributes {dimension_semantics = [#tpu.dimension_semantics<parallel>], iteration_bounds = array<i64: 1>, scalar_prefetch = 0 : i64, scratch_operands = 0 : i64, tpu.core_type = #tpu.core_type<tc>, window_params = [{transform_indices = @transform_0, window_bounds = array<i64: 16, 128>}, {pipeline_mode = #tpu.pipeline_mode<synchronous>, transform_indices = @transform_1, window_bounds = array<i64: 128, 256>}, {pipeline_mode = #tpu.pipeline_mode<synchronous>, transform_indices = @transform_2, window_bounds = array<i64: 1, 256>}, {transform_indices = @transform_3, window_bounds = array<i64: 16, 128>}, {transform_indices = @transform_4, window_bounds = array<i64: 16, 128>}]} {
    %c0 = arith.constant 0 : index
    %c0_0 = arith.constant 0 : index
    %0 = vector.load %arg1[%c0, %c0_0] : memref<16x128xf32, #tpu.memory_space<vmem>>, vector<16x128xf32>
    %1 = arith.truncf %0 : vector<16x128xf32> to vector<16x128xbf16>
    %c0_1 = arith.constant 0 : index
    %c0_2 = arith.constant 0 : index
    %2 = vector.load %arg2[%c0_1, %c0_2] : memref<128x256xbf16, #tpu.memory_space<vmem>>, vector<128x256xbf16>
    %cst = arith.constant dense<0.000000e+00> : vector<16x256xf32>
    %3 = tpu.matmul %1, %2, %cst {dimension_numbers = #tpu.dot_dimension_numbers<[1], [0], [0], [1], [0, 0, 1, 1], [], []>} : vector<16x128xbf16>, vector<128x256xbf16>, vector<16x256xf32> -> vector<16x256xf32>
    %c0_3 = arith.constant 0 : index
    %c0_4 = arith.constant 0 : index
    %4 = vector.load %arg3[%c0_3, %c0_4] : memref<1x256xf32, #tpu.memory_space<vmem>>, vector<1x256xf32>
    %5 = vector.broadcast %4 : vector<1x256xf32> to vector<16x256xf32>
    %6 = arith.addf %3, %5 : vector<16x256xf32>
    %7 = vector.extract_strided_slice %6 {offsets = [0, 0], sizes = [16, 128], strides = [1, 1]} : vector<16x256xf32> to vector<16x128xf32>
    %c0_5 = arith.constant 0 : index
    %c0_6 = arith.constant 0 : index
    %8 = vector.load %arg4[%c0_5, %c0_6] : memref<16x128xf32, #tpu.memory_space<vmem>>, vector<16x128xf32>
    tpu.vector_store %arg4[%c0_5, %c0_6], %7 {strides = array<i32>} : memref<16x128xf32, #tpu.memory_space<vmem>>, vector<16x128xf32>,
    %9 = vector.extract_strided_slice %6 {offsets = [0, 128], sizes = [16, 128], strides = [1, 1]} : vector<16x256xf32> to vector<16x128xf32>
    %c0_7 = arith.constant 0 : index
    %c0_8 = arith.constant 0 : index
    %10 = vector.load %arg5[%c0_7, %c0_8] : memref<16x128xf32, #tpu.memory_space<vmem>>, vector<16x128xf32>
    tpu.vector_store %arg5[%c0_7, %c0_8], %9 {strides = array<i32>} : memref<16x128xf32, #tpu.memory_space<vmem>>, vector<16x128xf32>,
    return
  }
  func.func @transform_0(%arg0: i32) -> (i32, i32) {
    %c0_i32 = arith.constant 0 : i32
    %c0_i32_0 = arith.constant 0 : i32
    return %arg0, %c0_i32 : i32, i32
  }
  func.func @transform_1(%arg0: i32) -> (i32, i32) {
    %c0_i32 = arith.constant 0 : i32
    %c0_i32_0 = arith.constant 0 : i32
    %c0_i32_1 = arith.constant 0 : i32
    return %c0_i32, %c0_i32_0 : i32, i32
  }
  func.func @transform_2(%arg0: i32) -> (i32, i32) {
    %c0_i32 = arith.constant 0 : i32
    %c0_i32_0 = arith.constant 0 : i32
    %c0_i32_1 = arith.constant 0 : i32
    return %c0_i32, %c0_i32_0 : i32, i32
  }
  func.func @transform_3(%arg0: i32) -> (i32, i32) {
    %c0_i32 = arith.constant 0 : i32
    %c0_i32_0 = arith.constant 0 : i32
    return %arg0, %c0_i32 : i32, i32
  }
  func.func @transform_4(%arg0: i32) -> (i32, i32) {
    %c0_i32 = arith.constant 0 : i32
    %c0_i32_0 = arith.constant 0 : i32
    return %arg0, %c0_i32 : i32, i32
  }
}

</mosaic_0001>

<bundles_post_ra>
// kernel: tpu_custom_call.1
= control target key start
LH: loop header
LB: loop body
LE: loop exit
PB: predicated region body
PF: predicated region fallthrough
CT: control target
= control target key end

     0   :  { %10 = vsyncpa [#allocation3], 0  ;;  %s512_s0 = inlined_call_operand.hbm [shape: f32[16,128], index: 0, kind: input, shape index: {}]   ;;  %s513_s1 = inlined_call_operand.hbm [shape: bf16[128,256], index: 1, kind: input, shape index: {}]   ;;  %s514_s2 = inlined_call_operand.hbm [shape: f32[1,256], index: 2, kind: input, shape index: {}]   ;;  %s515_s3 = inlined_call_operand.hbm [shape: f32[16,128], index: 3, kind: output, shape index: {0}]   ;;  %s516_s4 = inlined_call_operand.hbm [shape: f32[16,128], index: 4, kind: output, shape index: {1}]  }
   0x1   :  { %11 = vsyncpa [#allocation6], 0 }
   0x2   :  { %12 = vsyncpa [#allocation4], 0 }
   0x3   :  { %13 = vsyncpa [#allocation10], 0  ;;  %s31_s17 = sshll.u32 %s513_s1, 4  ;;  %s453_s18 = smov [#allocation5]   ;;  %s32_s17 = int_to_ptr.hbm [resolvable:$true] %s31_s17 }
   0x4   :  { %s33_s19 = sshll.u32 %s453_s18, 4  ;;  %s18_s22 = sshll.u32 %s512_s0, 4  ;;  %s34_s19 = int_to_ptr.vmem [resolvable:$true] %s33_s19  ;;  %s19_s22 = int_to_ptr.hbm [resolvable:$true] %s18_s22 }
   0x5   :  { %s454_s23 = smov 128   ;;  %s455_s24 = smov 8  }
   0x6   :  { %39 = dma.hbm_to_vmem [thread:$0]  %s32_s17, 2048, %s34_s19, [#allocation6], %s454_s23, %s454_s23, %s455_s24  }
   0x7   :  { %s456_s25 = smov [#allocation2]   ;;  %s45_s1 = sshll.u32 %s514_s2, 4  ;;  %s46_s1 = int_to_ptr.hbm [resolvable:$true] %s45_s1 }
   0x8   :  { %s20_s26 = sshll.u32 %s456_s25, 4  ;;  %s457_s0 = smov [#allocation7]   ;;  %s21_s26 = int_to_ptr.vmem [resolvable:$true] %s20_s26 }
   0x9   :  { %26 = dma.hbm_to_vmem [thread:$0]  %s19_s22, 256, %s21_s26, [#allocation3], %s454_s23, %s454_s23, %s455_s24  }
   0xa   :  { %s47_s29 = sshll.u32 %s457_s0, 4  ;;  %s48_s29 = int_to_ptr.vmem [resolvable:$true] %s47_s29 }
   0xb   :  { %50 = dma.hbm_to_vmem [thread:$0]  %s46_s1, 32, %s48_s29, [#allocation6]  }
   0xc   :  { %445 = dma.done.wait [#allocation3], 256  }
   0xd   :  { %446 = vsyncadd [#allocation3], 4294967040 }
   0xe   :  { %447 = dma.done.wait [#allocation6], 2080  }
   0xf   :  { %448 = vsyncadd [#allocation6], 4294965216  ;;  %v296_v0 = vld [vmem:[#allocation5 + $0x70] sm:$0xf]  ;;  %v317_v1 = vld [vmem:[#allocation5 + $0x74] sm:$0xf0] }
  0x10   :  { %v316_v2 = vld [vmem:[#allocation5 + $0x74] sm:$0xf]  ;;  %v297_v3 = vor.u32 %v317_v1, %v296_v0  ;;  %v298_v4 = vld [vmem:[#allocation5 + $0x78] sm:$0xf0]  ;;  %v288_v5 = vld [vmem:[#allocation5 + $0x60] sm:$0xf] }
  0x11   :  { %v315_v6 = vld [vmem:[#allocation5 + $0x64] sm:$0xf0]  ;;  %v301_v7 = vor.u32 %v316_v2, %v298_v4  ;;  %v314_v8 = vld [vmem:[#allocation5 + $0x64] sm:$0xf]  ;;  %v290_v9 = vld [vmem:[#allocation5 + $0x68] sm:$0xf0] }
  0x12   :  { %168 = vmatpush.bf16.msra.mxu0 %v297_v3  ;;  %v289_v10 = vor.u32 %v315_v6, %v288_v5  ;;  %v293_v11 = vor.u32 %v314_v8, %v290_v9  ;;  %v280_v12 = vld [vmem:[#allocation5 + $0x50] sm:$0xf]  ;;  %v313_v13 = vld [vmem:[#allocation5 + $0x54] sm:$0xf0]  ;;  %v312_v14 = vld [vmem:[#allocation5 + $0x54] sm:$0xf] }
  0x13   :  { %182 = vmatpush.bf16.msra.mxu1 %v301_v7  ;;  %v282_v15 = vld [vmem:[#allocation5 + $0x58] sm:$0xf0]  ;;  %v281_v16 = vor.u32 %v313_v13, %v280_v12  ;;  %v272_v18 = vld [vmem:[#allocation5 + $0x40] sm:$0xf]  ;;  %v311_v19 = vld [vmem:[#allocation5 + $0x44] sm:$0xf0] }
  0x14   :  { %v285_v17 = vor.u32 %v312_v14, %v282_v15  ;;  %v310_v20 = vld [vmem:[#allocation5 + $0x44] sm:$0xf]  ;;  %v274_v21 = vld [vmem:[#allocation5 + $0x48] sm:$0xf0]  ;;  %v273_v22 = vor.u32 %v311_v19, %v272_v18  ;;  %v264_v24 = vld [vmem:[#allocation5 + $0x30] sm:$0xf] }
  0x15   :  { %v277_v23 = vor.u32 %v310_v20, %v274_v21  ;;  %v309_v25 = vld [vmem:[#allocation5 + $0x34] sm:$0xf0]  ;;  %v308_v26 = vld [vmem:[#allocation5 + $0x34] sm:$0xf]  ;;  %v266_v27 = vld [vmem:[#allocation5 + $0x38] sm:$0xf0] }
  0x16   :  { %169 = vmatpush.bf16.msra.mxu0 %v289_v10  ;;  %v265_v28 = vor.u32 %v309_v25, %v264_v24  ;;  %v269_v29 = vor.u32 %v308_v26, %v266_v27  ;;  %v256_v30 = vld [vmem:[#allocation5 + $0x20] sm:$0xf]  ;;  %v307_v31 = vld [vmem:[#allocation5 + $0x24] sm:$0xf0]  ;;  %v306_v32 = vld [vmem:[#allocation5 + $0x24] sm:$0xf] }
  0x17   :  { %183 = vmatpush.bf16.msra.mxu1 %v293_v11  ;;  %v258_v33 = vld [vmem:[#allocation5 + $0x28] sm:$0xf0]  ;;  %v257_v34 = vor.u32 %v307_v31, %v256_v30  ;;  %v248_v36 = vld [vmem:[#allocation5 + $0x10] sm:$0xf]  ;;  %v305_v37 = vld [vmem:[#allocation5 + $0x14] sm:$0xf0] }
  0x18   :  { %v261_v35 = vor.u32 %v306_v32, %v258_v33  ;;  %v304_v38 = vld [vmem:[#allocation5 + $0x14] sm:$0xf]  ;;  %v250_v39 = vld [vmem:[#allocation5 + $0x18] sm:$0xf0]  ;;  %v249_v40 = vor.u32 %v305_v37, %v248_v36  ;;  %v240_v42 = vld [vmem:[#allocation5] sm:$0xf] }
  0x19   :  { %v253_v41 = vor.u32 %v304_v38, %v250_v39  ;;  %v303_v43 = vld [vmem:[#allocation5 + $0x4] sm:$0xf0]  ;;  %v302_v44 = vld [vmem:[#allocation5 + $0x4] sm:$0xf]  ;;  %v242_v45 = vld [vmem:[#allocation5 + $0x8] sm:$0xf0] }
  0x1a   :  { %170 = vmatpush.bf16.msra.mxu0 %v281_v16  ;;  %v241_v46 = vor.u32 %v303_v43, %v240_v42  ;;  %v63_v47 = vld [vmem:[#allocation2] sm:$0xff]  ;;  %v64_v48 = vld [vmem:[#allocation2 + $0x8] sm:$0xff]  ;;  %v245_v49 = vor.u32 %v302_v44, %v242_v45  ;;  %v82_v51 = vld [vmem:[#allocation7] sm:$0x3]  ;;  %s458_s2 = smov [#allocation8]   ;;  %s206_s7 = sshll.u32 %s515_s3, 4  ;;  %s207_s7 = int_to_ptr.hbm [resolvable:$true] %s206_s7 }
  0x1b   :  { %184 = vmatpush.bf16.msra.mxu1 %v285_v17  ;;  %v65_v50 = vpack.c.bf16 %v64_v48, %v63_v47  ;;  %v84_v52 = vperm.slane %v82_v51, 0  ;;  %v85_v53 = vperm.slane %v82_v51, 1  ;;  %s204_s30 = sshll.u32 %s458_s2, 4  ;;  %s459_s8 = smov [#allocation9]   ;;  %s205_s30 = int_to_ptr.vmem [resolvable:$true] %s204_s30 }
  0x1c   :  { %s217_s9 = sshll.u32 %s459_s8, 4  ;;  %s219_s12 = sshll.u32 %s516_s4, 4  ;;  %s218_s9 = int_to_ptr.vmem [resolvable:$true] %s217_s9  ;;  %s220_s12 = int_to_ptr.hbm [resolvable:$true] %s219_s12 }
  0x1e   :  { %171 = vmatpush.bf16.msra.mxu0 %v273_v22 }
  0x1f   :  { %185 = vmatpush.bf16.msra.mxu1 %v277_v23 }
  0x22   :  { %172 = vmatpush.bf16.msra.mxu0 %v265_v28 }
  0x23   :  { %186 = vmatpush.bf16.msra.mxu1 %v269_v29 }
  0x26   :  { %173 = vmatpush.bf16.msra.mxu0 %v257_v34 }
  0x27   :  { %187 = vmatpush.bf16.msra.mxu1 %v261_v35 }
  0x2a   :  { %174 = vmatpush.bf16.msra.mxu0 %v249_v40 }
  0x2b   :  { %188 = vmatpush.bf16.msra.mxu1 %v253_v41 }
  0x2e   :  { %175 = vmatpush.bf16.msra.mxu0 %v241_v46 }
  0x2f   :  { %189 = vmatpush.bf16.msra.mxu1 %v245_v49 }
  0x31   :  { %176 = vmatmul.bf16.vlgmr.msra.gmra.mxu0 %v65_v50 }
  0x32   :  { %190 = vmatmul.bf16.vlgmr.msra.gmra.mxu1 %v65_v50 }
  0xae   :  { %v177_v54 = vpop.f32.mrf.mxu0 }
  0xaf   :  { %v178_v55 = vadd.f32 %v177_v54, %v84_v52  ;;  %v191_v56 = vpop.f32.mrf.mxu1 }
  0xb0   :  { %v192_v57 = vadd.f32 %v191_v56, %v85_v53 }
  0xb1   :  { %196 = vst [vmem:[#allocation8] sm:$0xff] %v178_v55 }
  0xb2   :  { %198 = vst [vmem:[#allocation9] sm:$0xff] %v192_v57 }
  0xb6   :  { %v179_v58 = vpop.f32.mrf.mxu0 }
  0xb7   :  { %v180_v59 = vadd.f32 %v179_v58, %v84_v52  ;;  %v193_v60 = vpop.f32.mrf.mxu1 }
  0xb8   :  { %v194_v61 = vadd.f32 %v193_v60, %v85_v53 }
  0xb9   :  { %197 = vst [vmem:[#allocation8 + $0x8] sm:$0xff] %v180_v59 }
  0xba   :  { %199 = vst [vmem:[#allocation9 + $0x8] sm:$0xff] %v194_v61  ;;  %212 = dma.vmem_to_hbm [thread:$0]  %s205_s30, 256, %s207_s7, [#allocation4], %s454_s23, %s454_s23, %s455_s24  }
  0xbb   :  { %225 = dma.vmem_to_hbm [thread:$0]  %s218_s9, 256, %s220_s12, [#allocation10], %s454_s23, %s454_s23, %s455_s24  }
  0xbc   :  { %449 = dma.done.wait [#allocation4], 256  }
  0xbd   :  { %450 = vsyncadd [#allocation4], 4294967040 }
  0xbe   :  { %451 = dma.done.wait [#allocation10], 256  }
  0xbf   :  { %452 = vsyncadd [#allocation10], 4294967040 }
  0xc0   :  { %234 = vsyncpa [#allocation3], 1 }
  0xc1   :  { %235 = vsyncpa [#allocation6], 1 }
  0xc2   :  { %236 = vsyncpa [#allocation4], 1 }
  0xc3   :  { %237 = vsyncpa [#allocation10], 1 }

</bundles_post_ra>
